<compile_context>
chip_gen: v6e
topology: v6e:2x2x1
jax: 0.10.0
libtpu: 0.0.40
codegen_flags: <defaults>
</compile_context>

<pallas_src>
import jax
import jax.numpy as jnp
from jax.experimental import pallas as pl
from jax.experimental.pallas import tpu as pltpu

_LANE = 128
_SUBLANE = 8


def _round_up(x: int, m: int) -> int:
    return ((x + m - 1) // m) * m


def _layer_plan(encoder_layers, decoder_layers):
    """Replicates the layer construction logic of the PyTorch AutoEncoder.

    Returns a list of (in_dim, out_dim, apply_relu) for the full forward pass
    (encoder followed by decoder)."""
    assert encoder_layers[-1] == decoder_layers[0], "latent dimensions must match"
    assert encoder_layers[0] == decoder_layers[-1], "full order dimensions must match"
    plan = []
    for dims in (encoder_layers, decoder_layers):
        n_linear = len(dims) - 1
        for k in range(n_linear):
            apply_relu = k < n_linear - 1  # ReLU after every Linear except the last
            plan.append((dims[k], dims[k + 1], apply_relu))
    return plan


def _make_mlp_kernel(relu_flags):
    """Fused kernel: chain of (bf16 matmul + f32 bias [+ relu]) layers."""
    n_layers = len(relu_flags)

    def kernel(*refs):
        # refs = [x_ref, w0, b0, w1, b1, ..., w_{L-1}, b_{L-1}, o_ref]
        x_ref = refs[0]
        o_ref = refs[-1]
        h = x_ref[...].astype(jnp.bfloat16)
        for li in range(n_layers):
            w_ref = refs[1 + 2 * li]
            b_ref = refs[2 + 2 * li]
            # bf16 x bf16 -> f32 accumulation on the MXU.
            acc = jnp.dot(h, w_ref[...], preferred_element_type=jnp.float32)
            acc = acc + b_ref[...]
            if relu_flags[li]:
                acc = jnp.maximum(acc, 0.0)
            if li == n_layers - 1:
                h = acc
            else:
                h = acc.astype(jnp.bfloat16)  # bf16 input to next matmul
        o_ref[...] = h.astype(o_ref.dtype)

    return kernel


def _choose_batch_tile(n, requested):
    tb = 512 if requested is None else int(requested)
    tb = min(tb, _round_up(n, _SUBLANE))
    tb = max(_SUBLANE, (tb // _SUBLANE) * _SUBLANE)
    return tb


def _vmem_limit_bytes(tb, d_in, d_out_pad, padded_w, padded_b, buffer_weights):
    in_bytes = 2 * tb * d_in * 2            # double-buffered bf16 input block
    out_bytes = 2 * tb * d_out_pad * 4      # double-buffered f32 output block
    wmult = 1 if buffer_weights else 2
    param_bytes = wmult * sum(int(w.size) * w.dtype.itemsize for w in padded_w)
    param_bytes += wmult * sum(int(b.size) * b.dtype.itemsize for b in padded_b)
    max_hidden = max(int(w.shape[1]) for w in padded_w)
    live_bytes = 4 * tb * max_hidden * 4    # headroom for live f32/bf16 intermediates
    needed = in_bytes + out_bytes + param_bytes + live_bytes + (8 << 20)
    try:
        cap = int(pltpu.get_tpu_info().vmem_capacity_bytes)
    except Exception:
        cap = 64 << 20                      # conservative (v7x physical VMEM)
    return int(min(max(needed, 32 << 20), int(cap * 0.75)))


def autoencoder_forward(x, weights, biases, relu_flags, *, batch_tile=None):
    """Fused AutoEncoder forward pass with a single pallas_call.

    x:       (N, D_in) float32 (or bf16)
    weights: list of (in_i, out_i) float32 arrays (pre-transposed vs torch)
    biases:  list of (1, out_i) float32 arrays
    """
    n, d_in = x.shape
    d_out = weights[-1].shape[1]
    relu_flags = tuple(bool(r) for r in relu_flags)
    out_dtype = x.dtype

    tb = _choose_batch_tile(n, batch_tile)
    n_pad = _round_up(n, tb)
    grid = (n_pad // tb,)

    # Cast params to bf16 and zero-pad feature dims to lane-dense multiples of
    # 128 (except the first layer's input dim, which follows x).  Zero padding
    # is exact: padded columns get zero weight + zero bias, padded rows feed
    # zero weights downstream.
    padded_w, padded_b = [], []
    for li, (w, b) in enumerate(zip(weights, biases)):
        din, dout = w.shape
        din_p = din if li == 0 else _round_up(din, _LANE)
        dout_p = _round_up(dout, _LANE)
        wp = jnp.zeros((din_p, dout_p), jnp.bfloat16).at[:din, :dout].set(
            w.astype(jnp.bfloat16))
        bp = jnp.zeros((1, dout_p), jnp.float32).at[:, :dout].set(
            jnp.reshape(b, (1, dout)).astype(jnp.float32))
        padded_w.append(wp)
        padded_b.append(bp)
    d_out_pad = padded_w[-1].shape[1]

    x_p = x.astype(jnp.bfloat16)
    if n_pad != n:
        x_p = jnp.pad(x_p, ((0, n_pad - n), (0, 0)))

    kernel = _make_mlp_kernel(relu_flags)

    def build(buffer_weights):
        const_kwargs = {"pipeline_mode": pl.Buffered(1)} if buffer_weights else {}
        in_specs = [pl.BlockSpec((tb, d_in), lambda i: (i, 0))]
        for w, b in zip(padded_w, padded_b):
            in_specs.append(pl.BlockSpec(w.shape, lambda i: (0, 0), **const_kwargs))
            in_specs.append(pl.BlockSpec(b.shape, lambda i: (0, 0), **const_kwargs))
        out_specs = pl.BlockSpec((tb, d_out_pad), lambda i: (i, 0))

        return pl.pallas_call(
            kernel,
            out_shape=jax.ShapeDtypeStruct((n_pad, d_out_pad), out_dtype),
            grid_spec=pltpu.PrefetchScalarGridSpec(
                num_scalar_prefetch=0,
                grid=grid,
                in_specs=in_specs,
                out_specs=out_specs,
            ),
            compiler_params=pltpu.CompilerParams(
                dimension_semantics=("parallel",),
                vmem_limit_bytes=_vmem_limit_bytes(
                    tb, d_in, d_out_pad, padded_w, padded_b, buffer_weights),
            ),
        )

    flat_params = []
    for w, b in zip(padded_w, padded_b):
        flat_params.extend([w, b])

    try:
        out = build(True)(x_p, *flat_params)
    except Exception:
        # Fallback if this JAX build rejects pipeline_mode=pl.Buffered(1).
        out = build(False)(x_p, *flat_params)

    return out[:n, :d_out]


def init_params(plan, seed=0):
    """Deterministic init mimicking torch Linear's uniform(-1/sqrt(in), 1/sqrt(in))."""
    key = jax.random.PRNGKey(seed)
    weights, biases = [], []
    for (din, dout, _relu) in plan:
        key, kw, kb = jax.random.split(key, 3)
        bound = 1.0 / (din ** 0.5)
        w = jax.random.uniform(kw, (din, dout), jnp.float32, -bound, bound)
        b = jax.random.uniform(kb, (1, dout), jnp.float32, -bound, bound)
        weights.append(w)
        biases.append(b)
    return weights, biases


def reference_forward(x, weights, biases, relu_flags):
    """Pure-JAX reference mirroring the kernel's bf16-input / f32-accum math."""
    n_layers = len(weights)
    h = x.astype(jnp.bfloat16)
    for li, (w, b, r) in enumerate(zip(weights, biases, relu_flags)):
        acc = jnp.dot(h, w.astype(jnp.bfloat16), preferred_element_type=jnp.float32)
        acc = acc + jnp.reshape(b, (1, -1)).astype(jnp.float32)
        if r:
            acc = jnp.maximum(acc, 0.0)
        h = acc if li == n_layers - 1 else acc.astype(jnp.bfloat16)
    return h.astype(x.dtype)


# TODO(synk): latent_size / plot / _color_vertices are offline analysis &
# visualization utilities (SVD, igraph) and are not part of the forward pass,
# so they are intentionally not translated to Pallas.

if __name__ == "__main__":
    # Small, forward-consistent configuration: 32 -> 16 -> 8 -> 16 -> 32.
    encoder_layers = [32, 16, 8]
    decoder_layers = [8, 16, 32]
    batch = 256          # small, but gives a 4-step grid with batch_tile=64
    batch_tile = 64      # multiple of 8; grid=(4,) -> pipelined DMAs, 2-TC sharding

    plan = _layer_plan(encoder_layers, decoder_layers)
    relu_flags = [r for (_, _, r) in plan]
    weights, biases = init_params(plan, seed=0)

    key = jax.random.PRNGKey(0)
    x = jax.random.normal(key, (batch, encoder_layers[0]), jnp.float32)

    out = autoencoder_forward(x, weights, biases, relu_flags, batch_tile=batch_tile)
    out = jax.block_until_ready(out)

    ref = reference_forward(x, weights, biases, relu_flags)
    assert out.shape == (batch, decoder_layers[-1])
    max_err = float(jnp.max(jnp.abs(out - ref)))
    assert max_err < 5e-3, f"mismatch vs JAX reference (max abs err {max_err})"

    print("KERNEL_OK")
</pallas_src>

<mosaic_0001>
module attributes {stable_mosaic.version = 11 : i64} {
  func.func @kernel(%arg0: i32, %arg1: memref<64x32xbf16, #tpu.memory_space<vmem>>, %arg2: memref<32x128xbf16, #tpu.memory_space<vmem>>, %arg3: memref<1x128xf32, #tpu.memory_space<vmem>>, %arg4: memref<128x128xbf16, #tpu.memory_space<vmem>>, %arg5: memref<1x128xf32, #tpu.memory_space<vmem>>, %arg6: memref<128x128xbf16, #tpu.memory_space<vmem>>, %arg7: memref<1x128xf32, #tpu.memory_space<vmem>>, %arg8: memref<128x128xbf16, #tpu.memory_space<vmem>>, %arg9: memref<1x128xf32, #tpu.memory_space<vmem>>, %arg10: memref<64x128xf32, #tpu.memory_space<vmem>>) attributes {dimension_semantics = [#tpu.dimension_semantics<parallel>], iteration_bounds = array<i64: 4>, scalar_prefetch = 0 : i64, scratch_operands = 0 : i64, tpu.core_type = #tpu.core_type<tc>, window_params = [{transform_indices = @transform_0, window_bounds = array<i64: 64, 32>}, {pipeline_mode = #tpu.pipeline_mode<synchronous>, transform_indices = @transform_1, window_bounds = array<i64: 32, 128>}, {pipeline_mode = #tpu.pipeline_mode<synchronous>, transform_indices = @transform_2, window_bounds = array<i64: 1, 128>}, {pipeline_mode = #tpu.pipeline_mode<synchronous>, transform_indices = @transform_3, window_bounds = array<i64: 128, 128>}, {pipeline_mode = #tpu.pipeline_mode<synchronous>, transform_indices = @transform_4, window_bounds = array<i64: 1, 128>}, {pipeline_mode = #tpu.pipeline_mode<synchronous>, transform_indices = @transform_5, window_bounds = array<i64: 128, 128>}, {pipeline_mode = #tpu.pipeline_mode<synchronous>, transform_indices = @transform_6, window_bounds = array<i64: 1, 128>}, {pipeline_mode = #tpu.pipeline_mode<synchronous>, transform_indices = @transform_7, window_bounds = array<i64: 128, 128>}, {pipeline_mode = #tpu.pipeline_mode<synchronous>, transform_indices = @transform_8, window_bounds = array<i64: 1, 128>}, {transform_indices = @transform_9, window_bounds = array<i64: 64, 128>}]} {
    %c0 = arith.constant 0 : index
    %c0_0 = arith.constant 0 : index
    %0 = vector.load %arg1[%c0, %c0_0] : memref<64x32xbf16, #tpu.memory_space<vmem>>, vector<64x32xbf16>
    %c0_1 = arith.constant 0 : index
    %c0_2 = arith.constant 0 : index
    %1 = vector.load %arg2[%c0_1, %c0_2] : memref<32x128xbf16, #tpu.memory_space<vmem>>, vector<32x128xbf16>
    %cst = arith.constant dense<0.000000e+00> : vector<64x128xf32>
    %2 = tpu.matmul %0, %1, %cst {dimension_numbers = #tpu.dot_dimension_numbers<[1], [0], [0], [1], [0, 0, 1, 1], [], []>} : vector<64x32xbf16>, vector<32x128xbf16>, vector<64x128xf32> -> vector<64x128xf32>
    %c0_3 = arith.constant 0 : index
    %c0_4 = arith.constant 0 : index
    %3 = vector.load %arg3[%c0_3, %c0_4] : memref<1x128xf32, #tpu.memory_space<vmem>>, vector<1x128xf32>
    %4 = vector.broadcast %3 : vector<1x128xf32> to vector<64x128xf32>
    %5 = arith.addf %2, %4 : vector<64x128xf32>
    %cst_5 = arith.constant 0.000000e+00 : f32
    %6 = vector.broadcast %cst_5 : f32 to vector<64x128xf32>
    %7 = arith.maximumf %5, %6 : vector<64x128xf32>
    %8 = arith.truncf %7 : vector<64x128xf32> to vector<64x128xbf16>
    %c0_6 = arith.constant 0 : index
    %c0_7 = arith.constant 0 : index
    %9 = vector.load %arg4[%c0_6, %c0_7] : memref<128x128xbf16, #tpu.memory_space<vmem>>, vector<128x128xbf16>
    %cst_8 = arith.constant dense<0.000000e+00> : vector<64x128xf32>
    %10 = tpu.matmul %8, %9, %cst_8 {dimension_numbers = #tpu.dot_dimension_numbers<[1], [0], [0], [1], [0, 0, 1, 1], [], []>} : vector<64x128xbf16>, vector<128x128xbf16>, vector<64x128xf32> -> vector<64x128xf32>
    %c0_9 = arith.constant 0 : index
    %c0_10 = arith.constant 0 : index
    %11 = vector.load %arg5[%c0_9, %c0_10] : memref<1x128xf32, #tpu.memory_space<vmem>>, vector<1x128xf32>
    %12 = vector.broadcast %11 : vector<1x128xf32> to vector<64x128xf32>
    %13 = arith.addf %10, %12 : vector<64x128xf32>
    %14 = arith.truncf %13 : vector<64x128xf32> to vector<64x128xbf16>
    %c0_11 = arith.constant 0 : index
    %c0_12 = arith.constant 0 : index
    %15 = vector.load %arg6[%c0_11, %c0_12] : memref<128x128xbf16, #tpu.memory_space<vmem>>, vector<128x128xbf16>
    %cst_13 = arith.constant dense<0.000000e+00> : vector<64x128xf32>
    %16 = tpu.matmul %14, %15, %cst_13 {dimension_numbers = #tpu.dot_dimension_numbers<[1], [0], [0], [1], [0, 0, 1, 1], [], []>} : vector<64x128xbf16>, vector<128x128xbf16>, vector<64x128xf32> -> vector<64x128xf32>
    %c0_14 = arith.constant 0 : index
    %c0_15 = arith.constant 0 : index
    %17 = vector.load %arg7[%c0_14, %c0_15] : memref<1x128xf32, #tpu.memory_space<vmem>>, vector<1x128xf32>
    %18 = vector.broadcast %17 : vector<1x128xf32> to vector<64x128xf32>
    %19 = arith.addf %16, %18 : vector<64x128xf32>
    %cst_16 = arith.constant 0.000000e+00 : f32
    %20 = vector.broadcast %cst_16 : f32 to vector<64x128xf32>
    %21 = arith.maximumf %19, %20 : vector<64x128xf32>
    %22 = arith.truncf %21 : vector<64x128xf32> to vector<64x128xbf16>
    %c0_17 = arith.constant 0 : index
    %c0_18 = arith.constant 0 : index
    %23 = vector.load %arg8[%c0_17, %c0_18] : memref<128x128xbf16, #tpu.memory_space<vmem>>, vector<128x128xbf16>
    %cst_19 = arith.constant dense<0.000000e+00> : vector<64x128xf32>
    %24 = tpu.matmul %22, %23, %cst_19 {dimension_numbers = #tpu.dot_dimension_numbers<[1], [0], [0], [1], [0, 0, 1, 1], [], []>} : vector<64x128xbf16>, vector<128x128xbf16>, vector<64x128xf32> -> vector<64x128xf32>
    %c0_20 = arith.constant 0 : index
    %c0_21 = arith.constant 0 : index
    %25 = vector.load %arg9[%c0_20, %c0_21] : memref<1x128xf32, #tpu.memory_space<vmem>>, vector<1x128xf32>
    %26 = vector.broadcast %25 : vector<1x128xf32> to vector<64x128xf32>
    %27 = arith.addf %24, %26 : vector<64x128xf32>
    %c0_22 = arith.constant 0 : index
    %c0_23 = arith.constant 0 : index
    %28 = vector.load %arg10[%c0_22, %c0_23] : memref<64x128xf32, #tpu.memory_space<vmem>>, vector<64x128xf32>
    tpu.vector_store %arg10[%c0_22, %c0_23], %27 {strides = array<i32>} : memref<64x128xf32, #tpu.memory_space<vmem>>, vector<64x128xf32>,
    return
  }
  func.func @transform_0(%arg0: i32) -> (i32, i32) {
    %c0_i32 = arith.constant 0 : i32
    %c0_i32_0 = arith.constant 0 : i32
    return %arg0, %c0_i32 : i32, i32
  }
  func.func @transform_1(%arg0: i32) -> (i32, i32) {
    %c0_i32 = arith.constant 0 : i32
    %c0_i32_0 = arith.constant 0 : i32
    %c0_i32_1 = arith.constant 0 : i32
    return %c0_i32, %c0_i32_0 : i32, i32
  }
  func.func @transform_2(%arg0: i32) -> (i32, i32) {
    %c0_i32 = arith.constant 0 : i32
    %c0_i32_0 = arith.constant 0 : i32
    %c0_i32_1 = arith.constant 0 : i32
    return %c0_i32, %c0_i32_0 : i32, i32
  }
  func.func @transform_3(%arg0: i32) -> (i32, i32) {
    %c0_i32 = arith.constant 0 : i32
    %c0_i32_0 = arith.constant 0 : i32
    %c0_i32_1 = arith.constant 0 : i32
    return %c0_i32, %c0_i32_0 : i32, i32
  }
  func.func @transform_4(%arg0: i32) -> (i32, i32) {
    %c0_i32 = arith.constant 0 : i32
    %c0_i32_0 = arith.constant 0 : i32
    %c0_i32_1 = arith.constant 0 : i32
    return %c0_i32, %c0_i32_0 : i32, i32
  }
  func.func @transform_5(%arg0: i32) -> (i32, i32) {
    %c0_i32 = arith.constant 0 : i32
    %c0_i32_0 = arith.constant 0 : i32
    %c0_i32_1 = arith.constant 0 : i32
    return %c0_i32, %c0_i32_0 : i32, i32
  }
  func.func @transform_6(%arg0: i32) -> (i32, i32) {
    %c0_i32 = arith.constant 0 : i32
    %c0_i32_0 = arith.constant 0 : i32
    %c0_i32_1 = arith.constant 0 : i32
    return %c0_i32, %c0_i32_0 : i32, i32
  }
  func.func @transform_7(%arg0: i32) -> (i32, i32) {
    %c0_i32 = arith.constant 0 : i32
    %c0_i32_0 = arith.constant 0 : i32
    %c0_i32_1 = arith.constant 0 : i32
    return %c0_i32, %c0_i32_0 : i32, i32
  }
  func.func @transform_8(%arg0: i32) -> (i32, i32) {
    %c0_i32 = arith.constant 0 : i32
    %c0_i32_0 = arith.constant 0 : i32
    %c0_i32_1 = arith.constant 0 : i32
    return %c0_i32, %c0_i32_0 : i32, i32
  }
  func.func @transform_9(%arg0: i32) -> (i32, i32) {
    %c0_i32 = arith.constant 0 : i32
    %c0_i32_0 = arith.constant 0 : i32
    return %arg0, %c0_i32 : i32, i32
  }
}

module attributes {stable_mosaic.version = 11 : i64} {
  func.func @kernel(%arg0: i32, %arg1: memref<64x32xbf16, #tpu.memory_space<vmem>>, %arg2: memref<32x128xbf16, #tpu.memory_space<vmem>>, %arg3: memref<1x128xf32, #tpu.memory_space<vmem>>, %arg4: memref<128x128xbf16, #tpu.memory_space<vmem>>, %arg5: memref<1x128xf32, #tpu.memory_space<vmem>>, %arg6: memref<128x128xbf16, #tpu.memory_space<vmem>>, %arg7: memref<1x128xf32, #tpu.memory_space<vmem>>, %arg8: memref<128x128xbf16, #tpu.memory_space<vmem>>, %arg9: memref<1x128xf32, #tpu.memory_space<vmem>>, %arg10: memref<64x128xf32, #tpu.memory_space<vmem>>) attributes {dimension_semantics = [#tpu.dimension_semantics<parallel>], iteration_bounds = array<i64: 4>, scalar_prefetch = 0 : i64, scratch_operands = 0 : i64, tpu.core_type = #tpu.core_type<tc>, window_params = [{transform_indices = @transform_0, window_bounds = array<i64: 64, 32>}, {pipeline_mode = #tpu.pipeline_mode<synchronous>, transform_indices = @transform_1, window_bounds = array<i64: 32, 128>}, {pipeline_mode = #tpu.pipeline_mode<synchronous>, transform_indices = @transform_2, window_bounds = array<i64: 1, 128>}, {pipeline_mode = #tpu.pipeline_mode<synchronous>, transform_indices = @transform_3, window_bounds = array<i64: 128, 128>}, {pipeline_mode = #tpu.pipeline_mode<synchronous>, transform_indices = @transform_4, window_bounds = array<i64: 1, 128>}, {pipeline_mode = #tpu.pipeline_mode<synchronous>, transform_indices = @transform_5, window_bounds = array<i64: 128, 128>}, {pipeline_mode = #tpu.pipeline_mode<synchronous>, transform_indices = @transform_6, window_bounds = array<i64: 1, 128>}, {pipeline_mode = #tpu.pipeline_mode<synchronous>, transform_indices = @transform_7, window_bounds = array<i64: 128, 128>}, {pipeline_mode = #tpu.pipeline_mode<synchronous>, transform_indices = @transform_8, window_bounds = array<i64: 1, 128>}, {transform_indices = @transform_9, window_bounds = array<i64: 64, 128>}]} {
    %c0 = arith.constant 0 : index
    %c0_0 = arith.constant 0 : index
    %0 = vector.load %arg1[%c0, %c0_0] : memref<64x32xbf16, #tpu.memory_space<vmem>>, vector<64x32xbf16>
    %c0_1 = arith.constant 0 : index
    %c0_2 = arith.constant 0 : index
    %1 = vector.load %arg2[%c0_1, %c0_2] : memref<32x128xbf16, #tpu.memory_space<vmem>>, vector<32x128xbf16>
    %cst = arith.constant dense<0.000000e+00> : vector<64x128xf32>
    %2 = tpu.matmul %0, %1, %cst {dimension_numbers = #tpu.dot_dimension_numbers<[1], [0], [0], [1], [0, 0, 1, 1], [], []>} : vector<64x32xbf16>, vector<32x128xbf16>, vector<64x128xf32> -> vector<64x128xf32>
    %c0_3 = arith.constant 0 : index
    %c0_4 = arith.constant 0 : index
    %3 = vector.load %arg3[%c0_3, %c0_4] : memref<1x128xf32, #tpu.memory_space<vmem>>, vector<1x128xf32>
    %4 = vector.broadcast %3 : vector<1x128xf32> to vector<64x128xf32>
    %5 = arith.addf %2, %4 : vector<64x128xf32>
    %cst_5 = arith.constant 0.000000e+00 : f32
    %6 = vector.broadcast %cst_5 : f32 to vector<64x128xf32>
    %7 = arith.maximumf %5, %6 : vector<64x128xf32>
    %8 = arith.truncf %7 : vector<64x128xf32> to vector<64x128xbf16>
    %c0_6 = arith.constant 0 : index
    %c0_7 = arith.constant 0 : index
    %9 = vector.load %arg4[%c0_6, %c0_7] : memref<128x128xbf16, #tpu.memory_space<vmem>>, vector<128x128xbf16>
    %cst_8 = arith.constant dense<0.000000e+00> : vector<64x128xf32>
    %10 = tpu.matmul %8, %9, %cst_8 {dimension_numbers = #tpu.dot_dimension_numbers<[1], [0], [0], [1], [0, 0, 1, 1], [], []>} : vector<64x128xbf16>, vector<128x128xbf16>, vector<64x128xf32> -> vector<64x128xf32>
    %c0_9 = arith.constant 0 : index
    %c0_10 = arith.constant 0 : index
    %11 = vector.load %arg5[%c0_9, %c0_10] : memref<1x128xf32, #tpu.memory_space<vmem>>, vector<1x128xf32>
    %12 = vector.broadcast %11 : vector<1x128xf32> to vector<64x128xf32>
    %13 = arith.addf %10, %12 : vector<64x128xf32>
    %14 = arith.truncf %13 : vector<64x128xf32> to vector<64x128xbf16>
    %c0_11 = arith.constant 0 : index
    %c0_12 = arith.constant 0 : index
    %15 = vector.load %arg6[%c0_11, %c0_12] : memref<128x128xbf16, #tpu.memory_space<vmem>>, vector<128x128xbf16>
    %cst_13 = arith.constant dense<0.000000e+00> : vector<64x128xf32>
    %16 = tpu.matmul %14, %15, %cst_13 {dimension_numbers = #tpu.dot_dimension_numbers<[1], [0], [0], [1], [0, 0, 1, 1], [], []>} : vector<64x128xbf16>, vector<128x128xbf16>, vector<64x128xf32> -> vector<64x128xf32>
    %c0_14 = arith.constant 0 : index
    %c0_15 = arith.constant 0 : index
    %17 = vector.load %arg7[%c0_14, %c0_15] : memref<1x128xf32, #tpu.memory_space<vmem>>, vector<1x128xf32>
    %18 = vector.broadcast %17 : vector<1x128xf32> to vector<64x128xf32>
    %19 = arith.addf %16, %18 : vector<64x128xf32>
    %cst_16 = arith.constant 0.000000e+00 : f32
    %20 = vector.broadcast %cst_16 : f32 to vector<64x128xf32>
    %21 = arith.maximumf %19, %20 : vector<64x128xf32>
    %22 = arith.truncf %21 : vector<64x128xf32> to vector<64x128xbf16>
    %c0_17 = arith.constant 0 : index
    %c0_18 = arith.constant 0 : index
    %23 = vector.load %arg8[%c0_17, %c0_18] : memref<128x128xbf16, #tpu.memory_space<vmem>>, vector<128x128xbf16>
    %cst_19 = arith.constant dense<0.000000e+00> : vector<64x128xf32>
    %24 = tpu.matmul %22, %23, %cst_19 {dimension_numbers = #tpu.dot_dimension_numbers<[1], [0], [0], [1], [0, 0, 1, 1], [], []>} : vector<64x128xbf16>, vector<128x128xbf16>, vector<64x128xf32> -> vector<64x128xf32>
    %c0_20 = arith.constant 0 : index
    %c0_21 = arith.constant 0 : index
    %25 = vector.load %arg9[%c0_20, %c0_21] : memref<1x128xf32, #tpu.memory_space<vmem>>, vector<1x128xf32>
    %26 = vector.broadcast %25 : vector<1x128xf32> to vector<64x128xf32>
    %27 = arith.addf %24, %26 : vector<64x128xf32>
    %c0_22 = arith.constant 0 : index
    %c0_23 = arith.constant 0 : index
    %28 = vector.load %arg10[%c0_22, %c0_23] : memref<64x128xf32, #tpu.memory_space<vmem>>, vector<64x128xf32>
    tpu.vector_store %arg10[%c0_22, %c0_23], %27 {strides = array<i32>} : memref<64x128xf32, #tpu.memory_space<vmem>>, vector<64x128xf32>,
    return
  }
  func.func @transform_0(%arg0: i32) -> (i32, i32) {
    %c0_i32 = arith.constant 0 : i32
    %c0_i32_0 = arith.constant 0 : i32
    return %arg0, %c0_i32 : i32, i32
  }
  func.func @transform_1(%arg0: i32) -> (i32, i32) {
    %c0_i32 = arith.constant 0 : i32
    %c0_i32_0 = arith.constant 0 : i32
    %c0_i32_1 = arith.constant 0 : i32
    return %c0_i32, %c0_i32_0 : i32, i32
  }
  func.func @transform_2(%arg0: i32) -> (i32, i32) {
    %c0_i32 = arith.constant 0 : i32
    %c0_i32_0 = arith.constant 0 : i32
    %c0_i32_1 = arith.constant 0 : i32
    return %c0_i32, %c0_i32_0 : i32, i32
  }
  func.func @transform_3(%arg0: i32) -> (i32, i32) {
    %c0_i32 = arith.constant 0 : i32
    %c0_i32_0 = arith.constant 0 : i32
    %c0_i32_1 = arith.constant 0 : i32
    return %c0_i32, %c0_i32_0 : i32, i32
  }
  func.func @transform_4(%arg0: i32) -> (i32, i32) {
    %c0_i32 = arith.constant 0 : i32
    %c0_i32_0 = arith.constant 0 : i32
    %c0_i32_1 = arith.constant 0 : i32
    return %c0_i32, %c0_i32_0 : i32, i32
  }
  func.func @transform_5(%arg0: i32) -> (i32, i32) {
    %c0_i32 = arith.constant 0 : i32
    %c0_i32_0 = arith.constant 0 : i32
    %c0_i32_1 = arith.constant 0 : i32
    return %c0_i32, %c0_i32_0 : i32, i32
  }
  func.func @transform_6(%arg0: i32) -> (i32, i32) {
    %c0_i32 = arith.constant 0 : i32
    %c0_i32_0 = arith.constant 0 : i32
    %c0_i32_1 = arith.constant 0 : i32
    return %c0_i32, %c0_i32_0 : i32, i32
  }
  func.func @transform_7(%arg0: i32) -> (i32, i32) {
    %c0_i32 = arith.constant 0 : i32
    %c0_i32_0 = arith.constant 0 : i32
    %c0_i32_1 = arith.constant 0 : i32
    return %c0_i32, %c0_i32_0 : i32, i32
  }
  func.func @transform_8(%arg0: i32) -> (i32, i32) {
    %c0_i32 = arith.constant 0 : i32
    %c0_i32_0 = arith.constant 0 : i32
    %c0_i32_1 = arith.constant 0 : i32
    return %c0_i32, %c0_i32_0 : i32, i32
  }
  func.func @transform_9(%arg0: i32) -> (i32, i32) {
    %c0_i32 = arith.constant 0 : i32
    %c0_i32_0 = arith.constant 0 : i32
    return %arg0, %c0_i32 : i32, i32
  }
}

</mosaic_0001>

<bundles_post_ra>
// kernel: tpu_custom_call.1
= control target key start
LH: loop header
LB: loop body
LE: loop exit
PB: predicated region body
PF: predicated region fallthrough
CT: control target
= control target key end

     0   :  { %14 = vsyncpa [#allocation3], 0  ;;  %s1615_s0 = inlined_call_operand.vmem [shape: bf16[256,32], index: 0, kind: input, shape index: {}]   ;;  %s1616_s1 = inlined_call_operand.vmem [shape: bf16[32,128], index: 1, kind: input, shape index: {}]   ;;  %s1617_s2 = inlined_call_operand.vmem [shape: f32[1,128], index: 2, kind: input, shape index: {}]   ;;  %s1618_s3 = inlined_call_operand.vmem [shape: bf16[128,128], index: 3, kind: input, shape index: {}]   ;;  %s1619_s4 = inlined_call_operand.vmem [shape: f32[1,128], index: 4, kind: input, shape index: {}]   ;;  %s1620_s5 = inlined_call_operand.vmem [shape: bf16[128,128], index: 5, kind: input, shape index: {}]   ;;  %s1621_s6 = inlined_call_operand.vmem [shape: f32[1,128], index: 6, kind: input, shape index: {}]   ;;  %s1622_s7 = inlined_call_operand.hbm [shape: bf16[128,128], index: 7, kind: input, shape index: {}]   ;;  %s1623_s8 = inlined_call_operand.vmem [shape: f32[1,128], index: 8, kind: input, shape index: {}]   ;;  %s1624_s9 = inlined_call_operand.hbm [shape: f32[256,128], index: 9, kind: output, shape index: {}]  }
   0x1   :  { %15 = vsyncpa [#allocation4], 0 }
   0x2   :  { %17 = vsyncpa [#allocation4 + $0x1], 0  ;;  %s1422_s30 = smov 0   ;;  %s1424_s10 = smov 0  }
   0x3   :  { %s1426_s11 = smov 0   ;;  %s1428_s12 = smov 0  }
   0x4 LB: > { %s1443_s13 = sadd.s32 4294967295, %s1364_s12   ;;  %s1011_s14 = sadd.s32 4294967294, %s1364_s12   ;;  %s1364_s12 = sphi %s1428_s12, %s1632_s12   ;;  %s1360_s11 = sphi %s1426_s11, %s1631_s11   ;;  %s1356_s10 = sphi %s1424_s10, %s1630_s10   ;;  %s1352_s30 = sphi %s1422_s30, %s1629_s30  }
   0x5   : > { %s1447_s15 = sadd.s32 1, %s1364_s12   ;;  %s224_s16 = sadd.s32 1, %s1360_s11 }
   0x6   : > { %s221_s17 = ssub.s32 %s1364_s12, %s1447_s15  ;;  %p234_p0 = scmp.ne.s32.totalorder %s1360_s11, %s1356_s10 }
   0x7   : > { %p222_p1 = scmp.eq.s32.totalorder %s221_s17, 0  ;;  %p235_p2 = scmp.eq.s32.totalorder %s1443_s13, 3 }
   0x8   : > { %p240_p3 = scmp.ne.s32.totalorder %s1356_s10, %s1352_s30  ;;  %p241_p4 = scmp.eq.s32.totalorder %s1011_s14, 3 }
   0x9   : > { %s1458_s18 = scalar_select %p222_p1, %s1360_s11, %s224_s16  }
   0xa   : > { %p1460_p5 = por %p235_p2, %p234_p0  ;;  %p1464_p6 = por %p241_p4, %p240_p3 }
   0xb   : > { %p1012_p7 = scmp.ge.s32.totalorder %s1364_s12, 1  ;;  %p248_p8 = scmp.lt.s32.totalorder %s1364_s12, 5 }
   0xc   : > { %s1626_s20 = scalar_select %p1464_p6, 1, 0 }
   0xd   : > { %p1204_p9 = scmp.eq.s32.totalorder %s1443_s13, 0  ;;  %p1471_p10 = pnand %p1012_p7, %p248_p8 }
   0xe   : > { %s1366_s22 = smov [#allocation2]  }
   0xf   : > { %s278_s23 = sshll.u32 %s1366_s22, 4  ;;  %p1196_p11 = pneg %p1471_p10  ;;  %s279_s23 = int_to_ptr.vmem [resolvable:$true] %s278_s23 }
  0x10   : > { %s1285_s24 = scalar_lea.vmem %s279_s23, 1024  ;;  %p1293_p3 = scmp.lt.s32.totalorder %s279_s23, %s279_s23 }
  0x11   : > { %p1197_p12 = pnand %p1204_p9, %p1196_p11  ;;  %p1286_p0 = scmp.ne.s32.totalorder %s279_s23, %s1285_s24 }
  0x12   : > { %p1294_p4 = scmp.lt.s32.totalorder %s1285_s24, %s1285_s24 }
  0x13   : > { %p1276_p13 = pneg %p1197_p12 }
  0x14   : > { %p1295_p6 = por %p1294_p4, %p1293_p3 }
  0x15   : > { %p1288_p1 = pnand %p1286_p0, %p1276_p13 }
  0x17   : > { %p1289_p2 = pneg %p1288_p1 }
  0x19   : > { %p1296_p7 = pnand %p1295_p6, %p1289_p2 }
  0x1b   : > { %1299 = shalt.err (!%p1296_p7)
}
  0x1c   : > { %s1367_s25 = smov 64   ;;  %s1368_s26 = smov 4  }
  0x1d   : > { %1199 = dma.hbm_to_vmem [thread:$0]  (!%p1197_p12), %s1622_s7, 1024, %s279_s23, [#allocation3], %s1367_s25, %s1367_s25, %s1368_s26  }
  0x1e   : > { %306 = sbr.rel (%p1471_p10) target bundleno = 884 (0x374), region = 56 }
  0x23   : > { %1343 = dma.done.wait (%p1204_p9), [#allocation3], 1024  }
  0x24   : > { %1345 = vsyncadd (%p1204_p9), [#allocation3], 4294966272  ;;  %s1018_s29 = sshll.u32 %s1443_s13, 3  ;;  %v1244_v0 = vld [vmem:[%s1616_s1 + $0x8] sm:$0xff]   ;;  %v1245_v1 = vld [vmem:[%s1616_s1] sm:$0xff]   ;;  %vm401_vm0 = vcmask 261120  }
  0x25   : > { %p343_p8 = scmp.lt.s32.totalorder %s1018_s29, 31  ;;  %1106 = vmatprep.subr.bf16.mxu0 %v1244_v0  ;;  %v1250_v5 = vld [vmem:[%s1618_s3 + $0x38] sm:$0xff]   ;;  %v1251_v6 = vld [vmem:[%s1618_s3 + $0x30] sm:$0xff]   ;;  %v1252_v7 = vld [vmem:[%s1618_s3 + $0x28] sm:$0xff]   ;;  %s339_s28 = sand.u32 1, %s1356_s10  }
  0x26   : > { %1107 = vmatpush3.bf16.msra.mxu0 %v1244_v0  ;;  %1118 = vmatprep.subr.bf16.mxu1 %v1250_v5  ;;  %v1253_v9 = vld [vmem:[%s1618_s3 + $0x20] sm:$0xff]   ;;  %v1254_v10 = vld [vmem:[%s1618_s3 + $0x18] sm:$0xff]   ;;  %v1255_v11 = vld [vmem:[%s1618_s3 + $0x10] sm:$0xff]   ;;  %s1063_s23 = sshll.u32 %s1443_s13, 10  ;;  %s1369_s27 = smov [#allocation5]  }
  0x27   : > { %s1634_s29 = smov (!%p343_p8, %s1018_s29), 31  ;;  %1108 = vmatprep.subr.bf16.mxu0 %v1245_v1  ;;  %1119 = vmatpush3.bf16.msra.mxu1 %v1250_v5  ;;  %v1256_v12 = vld [vmem:[%s1618_s3 + $0x8] sm:$0xff]   ;;  %v1257_v13 = vld [vmem:[%s1618_s3] sm:$0xff]   ;;  %v1258_v14 = vld [vmem:[%s1620_s5 + $0x38] sm:$0xff]   ;;  %s1571_s26 = scalar_lea.hbm %s1624_s9, %s1063_s23 }
  0x28   : > { %s1019_s14 = sshll.u32 %s1634_s29, 2  ;;  %1120 = vmatprep.subr.bf16.mxu1 %v1251_v6  ;;  %v1259_v15 = vld [vmem:[%s1620_s5 + $0x30] sm:$0xff]   ;;  %v1260_v16 = vld [vmem:[%s1620_s5 + $0x28] sm:$0xff]   ;;  %v1261_v17 = vld [vmem:[%s1620_s5 + $0x20] sm:$0xff]   ;;  %s1017_s29 = sshll.u32 %s339_s28, 6 }
  0x29   : > { %s346_s22 = scalar_lea.vmem %s1615_s0, %s1019_s14  ;;  %v1262_v18 = vld [vmem:[%s1620_s5 + $0x18] sm:$0xff]   ;;  %v1020_v21 = vld [vmem:[%s1617_s2] ss:$0 sm:$0xff]  ;;  %v1263_v48 = vld [vmem:[%s1620_s5 + $0x10] sm:$0xff]   ;;  %s341_s17 = scalar_lea.vmem [#allocation5], %s1017_s29 }
  0x2a   : > { %v1246_v2 = vld [vmem:[%s346_s22] sm:$0xff]   ;;  %v1247_v3 = vld [vmem:[%s346_s22 + $0x8] sm:$0xff]   ;;  %v1248_v4 = vld [vmem:[%s346_s22 + $0x10] sm:$0xff]   ;;  %1109 = vmatpush3.bf16.msra.mxu0 %v1245_v1  ;;  %s937_s24 = sshll.u32 %s341_s17, 4  ;;  %s1304_s29 = sshll.u32 %s1369_s27, 4  ;;  %s1566_s24 = int_to_ptr.vmem [resolvable:$true] %s937_s24  ;;  %s1305_s29 = int_to_ptr.vmem [resolvable:$false] %s1304_s29 }
  0x2b   : > { %1110 = vmatprep.mubr.msk.bf16.mxu0 %vm401_vm0, %v1246_v2  ;;  %v1249_v8 = vld [vmem:[%s346_s22 + $0x18] sm:$0xff]   ;;  %1121 = vmatpush3.bf16.msra.mxu1 %v1251_v6  ;;  %v1264_v49 = vld [vmem:[%s1620_s5 + $0x8] sm:$0xff]   ;;  %v1265_v50 = vld [vmem:[%s1620_s5] sm:$0xff]   ;;  %s1575_s22 = scalar_lea.sflag [#allocation4], %s339_s28  ;;  %s1300_s13 = scalar_lea.vmem %s1566_s24, 1024 }
  0x2c   : > { %1122 = vmatprep.subr.bf16.mxu1 %v1252_v7  ;;  %1142 = vmatprep.subr.bf16.mxu0 %v1258_v14  ;;  %v1266_v51 = vld [vmem:[#allocation2 + $0x38] sm:$0xff]   ;;  %v1267_v52 = vld [vmem:[#allocation2 + $0x30] sm:$0xff]   ;;  %v1268_v53 = vld [vmem:[#allocation2 + $0x28] sm:$0xff]   ;;  %p1301_p6 = scmp.ne.s32.totalorder %s1566_s24, %s1300_s13  ;;  %s1306_s14 = scalar_lea.vmem %s1305_s29, 2048 }
  0x2d   : > { %1111 = vmatmul.mubr.msk.bf16.vlgmr.msra.gmra.mxu0 %vm401_vm0, %v1247_v3  ;;  %v1269_v54 = vld [vmem:[#allocation2 + $0x20] sm:$0xff]   ;;  %v1270_v55 = vld [vmem:[#allocation2 + $0x18] sm:$0xff]   ;;  %p1307_p11 = scmp.lt.s32.totalorder %s1566_s24, %s1305_s29  ;;  %p1308_p12 = scmp.lt.s32.totalorder %s1306_s14, %s1300_s13 }
  0x2e   : > { %1114 = vmatprep.mubr.msk.bf16.mxu0 %vm401_vm0, %v1248_v4  ;;  %1143 = vmatpush3.bf16.msra.mxu0 %v1258_v14  ;;  %v1031_v59 = vld [vmem:[%s1619_s4] ss:$0 sm:$0xff]  ;;  %v1272_v14 = vld [vmem:[#allocation2 + $0x8] sm:$0xff]   ;;  %p1302_p9 = pnand %p1301_p6, %p1460_p5 }
  0x2f   : > { %1123 = vmatpush3.bf16.msra.mxu1 %v1252_v7  ;;  %1144 = vmatprep.subr.bf16.mxu0 %v1259_v15  ;;  %p1309_p13 = por %p1308_p12, %p1307_p11 }
  0x30   : > { %1124 = vmatprep.subr.bf16.mxu1 %v1253_v9  ;;  %p1303_p10 = pneg %p1302_p9 }
  0x32   : > { %1145 = vmatpush3.bf16.msra.mxu0 %v1259_v15  ;;  %v1273_v15 = vld [vmem:[#allocation2] sm:$0xff]   ;;  %p1310_p0 = pnand %p1309_p13, %p1303_p10 }
  0x33   : > { %1125 = vmatpush3.bf16.msra.mxu1 %v1253_v9  ;;  %1146 = vmatprep.subr.bf16.mxu0 %v1260_v16 }
  0x34   : > { %1126 = vmatprep.subr.bf16.mxu1 %v1254_v10 }
  0x35   : > { %1115 = vmatmul.mubr.msk.bf16.gmra.mxu0 %vm401_vm0, %v1249_v8 }
  0x36   : > { %1147 = vmatpush3.bf16.msra.mxu0 %v1260_v16 }
  0x37   : > { %1127 = vmatpush3.bf16.msra.mxu1 %v1254_v10  ;;  %1148 = vmatprep.subr.bf16.mxu0 %v1261_v17 }
  0x38   : > { %1128 = vmatprep.subr.bf16.mxu1 %v1255_v11 }
  0x3a   : > { %1149 = vmatpush3.bf16.msra.mxu0 %v1261_v17 }
  0x3b   : > { %1129 = vmatpush3.bf16.msra.mxu1 %v1255_v11  ;;  %1150 = vmatprep.subr.bf16.mxu0 %v1262_v18 }
  0x3c   : > { %1130 = vmatprep.subr.bf16.mxu1 %v1256_v12 }
  0x3e   : > { %1151 = vmatpush3.bf16.msra.mxu0 %v1262_v18  ;;  %v1040_v18 = vld [vmem:[%s1621_s6] ss:$0 sm:$0xff] }
  0x3f   : > { %1131 = vmatpush3.bf16.msra.mxu1 %v1256_v12  ;;  %1152 = vmatprep.subr.bf16.mxu0 %v1263_v48 }
  0x40   : > { %1132 = vmatprep.subr.bf16.mxu1 %v1257_v13 }
  0x42   : > { %1153 = vmatpush3.bf16.msra.mxu0 %v1263_v48 }
  0x43   : > { %1133 = vmatpush3.bf16.msra.mxu1 %v1257_v13  ;;  %1154 = vmatprep.subr.bf16.mxu0 %v1264_v49  ;;  %v1271_v13 = vld [vmem:[#allocation2 + $0x10] sm:$0xff]  }
  0x44   : > { %1166 = vmatprep.subr.bf16.mxu1 %v1266_v51 }
  0x46   : > { %1155 = vmatpush3.bf16.msra.mxu0 %v1264_v49 }
  0x47   : > { %1156 = vmatprep.subr.bf16.mxu0 %v1265_v50 }
  0x4a   : > { %1157 = vmatpush3.bf16.msra.mxu0 %v1265_v50 }
  0xed   : > { %v1112_v19 = vpop.f32.mrf.mxu0 }
  0xee   : > { %v457_v25 = vadd.f32 %v1112_v19, %v1020_v21 }
  0xef   : > { %v448_v20 = vpop.f32.mrf.mxu0 }
  0xf0   : > { %v449_v23 = vadd.f32 %v1020_v21, %v448_v20  ;;  %v481_v32 = vmax.f32 %v457_v25, 0.0 }
  0xf1   : > { %v1113_v22 = vpop.f32.mrf.mxu0 }
  0xf2   : > { %v460_v24 = vadd.f32 %v1113_v22, %v1020_v21  ;;  %v479_v30 = vmax.f32 %v449_v23, 0.0 }
  0xf3   : > { %v451_v26 = vpop.f32.mrf.mxu0 }
  0xf4   : > { %v452_v27 = vadd.f32 %v1020_v21, %v451_v26  ;;  %v482_v28 = vmax.f32 %v460_v24, 0.0 }
  0xf5   : > { %v1116_v29 = vpop.f32.mrf.mxu0 }
  0xf6   : > { %v480_v31 = vmax.f32 %v452_v27, 0.0  ;;  %v488_v35 = vpack.c.bf16 %v482_v28, %v481_v32  ;;  %v473_v39 = vadd.f32 %v1116_v29, %v1020_v21 }
  0xf7   : > { %v464_v33 = vpop.f32.mrf.mxu0 }
  0xf8   : > { %v487_v34 = vpack.c.bf16 %v480_v31, %v479_v30  ;;  %v465_v37 = vadd.f32 %v1020_v21, %v464_v33  ;;  %v485_v45 = vmax.f32 %v473_v39, 0.0 }
  0xf9   : > { %v1117_v36 = vpop.f32.mrf.mxu0 }
  0xfa   : > { %v476_v38 = vadd.f32 %v1117_v36, %v1020_v21  ;;  %1134 = vmatprep.mubr.bf16.mxu1 %v487_v34  ;;  %v483_v43 = vmax.f32 %v465_v37, 0.0 }
  0xfb   : > { %v467_v40 = vpop.f32.mrf.mxu0  ;;  %1135 = vmatmul.mubr.bf16.vlgmr.msra.gmra.mxu1 %v488_v35 }
  0xfc   : > { %v468_v41 = vadd.f32 %v1020_v21, %v467_v40  ;;  %v486_v42 = vmax.f32 %v476_v38, 0.0  ;;  %1167 = vmatpush3.bf16.msra.mxu1 %v1266_v51 }
  0xfd   : > { %1168 = vmatprep.subr.bf16.mxu1 %v1267_v52 }
  0xfe   : > { %v484_v44 = vmax.f32 %v468_v41, 0.0  ;;  %v490_v47 = vpack.c.bf16 %v486_v42, %v485_v45  ;;  %v1049_v45 = vld [vmem:[%s1623_s8] ss:$0 sm:$0xff] }
 0x100   : > { %v489_v46 = vpack.c.bf16 %v484_v44, %v483_v43  ;;  %1169 = vmatpush3.bf16.msra.mxu1 %v1267_v52 }
 0x101   : > { %1170 = vmatprep.subr.bf16.mxu1 %v1268_v53 }
 0x102   : > { %1138 = vmatprep.mubr.bf16.mxu1 %v489_v46 }
 0x103   : > { %1139 = vmatmul.mubr.bf16.gmra.mxu1 %v490_v47 }
 0x104   : > { %1171 = vmatpush3.bf16.msra.mxu1 %v1268_v53 }
 0x105   : > { %1172 = vmatprep.subr.bf16.mxu1 %v1269_v54 }
 0x108   : > { %1173 = vmatpush3.bf16.msra.mxu1 %v1269_v54 }
 0x109   : > { %1174 = vmatprep.subr.bf16.mxu1 %v1270_v55 }
 0x10c   : > { %1175 = vmatpush3.bf16.msra.mxu1 %v1270_v55 }
 0x10d   : > { %1176 = vmatprep.subr.bf16.mxu1 %v1271_v13 }
 0x110   : > { %1177 = vmatpush3.bf16.msra.mxu1 %v1271_v13 }
 0x111   : > { %1178 = vmatprep.subr.bf16.mxu1 %v1272_v14 }
 0x114   : > { %1179 = vmatpush3.bf16.msra.mxu1 %v1272_v14 }
 0x115   : > { %1180 = vmatprep.subr.bf16.mxu1 %v1273_v15 }
 0x118   : > { %1181 = vmatpush3.bf16.msra.mxu1 %v1273_v15 }
 0x1bb   : > { %v1136_v56 = vpop.f32.mrf.mxu1 }
 0x1bc   : > { %v605_v0 = vadd.f32 %v1136_v56, %v1031_v59 }
 0x1bd   : > { %v596_v57 = vpop.f32.mrf.mxu1 }
 0x1be   : > { %v597_v62 = vadd.f32 %v1031_v59, %v596_v57 }
 0x1bf   : > { %v1137_v58 = vpop.f32.mrf.mxu1 }
 0x1c0   : > { %v608_v60 = vadd.f32 %v1137_v58, %v1031_v59 }
 0x1c1   : > { %v599_v61 = vpop.f32.mrf.mxu1 }
 0x1c2   : > { %v600_v63 = vadd.f32 %v1031_v59, %v599_v61  ;;  %v628_v3 = vpack.c.bf16 %v608_v60, %v605_v0 }
 0x1c3   : > { %v1140_v1 = vpop.f32.mrf.mxu1 }
 0x1c4   : > { %v627_v2 = vpack.c.bf16 %v600_v63, %v597_v62  ;;  %v621_v10 = vadd.f32 %v1140_v1, %v1031_v59 }
 0x1c5   : > { %v612_v4 = vpop.f32.mrf.mxu1 }
 0x1c6   : > { %1158 = vmatprep.mubr.bf16.mxu0 %v627_v2  ;;  %v613_v8 = vadd.f32 %v1031_v59, %v612_v4 }
 0x1c7   : > { %v1141_v5 = vpop.f32.mrf.mxu1  ;;  %1159 = vmatmul.mubr.bf16.vlgmr.msra.gmra.mxu0 %v628_v3 }
 0x1c8   : > { %v624_v6 = vadd.f32 %v1141_v5, %v1031_v59 }
 0x1c9   : > { %v615_v7 = vpop.f32.mrf.mxu1 }
 0x1ca   : > { %v616_v9 = vadd.f32 %v1031_v59, %v615_v7  ;;  %v630_v12 = vpack.c.bf16 %v624_v6, %v621_v10 }
 0x1cc   : > { %v629_v11 = vpack.c.bf16 %v616_v9, %v613_v8 }
 0x1ce   : > { %1162 = vmatprep.mubr.bf16.mxu0 %v629_v11 }
 0x1cf   : > { %1163 = vmatmul.mubr.bf16.gmra.mxu0 %v630_v12 }
 0x287   : > { %v1160_v16 = vpop.f32.mrf.mxu0 }
 0x288   : > { %v745_v22 = vadd.f32 %v1160_v16, %v1040_v18 }
 0x289   : > { %v736_v17 = vpop.f32.mrf.mxu0 }
 0x28a   : > { %v737_v20 = vadd.f32 %v1040_v18, %v736_v17  ;;  %v769_v29 = vmax.f32 %v745_v22, 0.0 }
 0x28b   : > { %v1161_v19 = vpop.f32.mrf.mxu0 }
 0x28c   : > { %v748_v21 = vadd.f32 %v1161_v19, %v1040_v18  ;;  %v767_v27 = vmax.f32 %v737_v20, 0.0 }
 0x28d   : > { %v739_v23 = vpop.f32.mrf.mxu0 }
 0x28e   : > { %v740_v24 = vadd.f32 %v1040_v18, %v739_v23  ;;  %v770_v25 = vmax.f32 %v748_v21, 0.0 }
 0x28f   : > { %v1164_v26 = vpop.f32.mrf.mxu0 }
 0x290   : > { %v768_v28 = vmax.f32 %v740_v24, 0.0  ;;  %v776_v32 = vpack.c.bf16 %v770_v25, %v769_v29  ;;  %v761_v36 = vadd.f32 %v1164_v26, %v1040_v18 }
 0x291   : > { %v752_v30 = vpop.f32.mrf.mxu0 }
 0x292   : > { %v775_v31 = vpack.c.bf16 %v768_v28, %v767_v27  ;;  %v753_v34 = vadd.f32 %v1040_v18, %v752_v30  ;;  %v773_v42 = vmax.f32 %v761_v36, 0.0 }
 0x293   : > { %v1165_v33 = vpop.f32.mrf.mxu0 }
 0x294   : > { %v764_v35 = vadd.f32 %v1165_v33, %v1040_v18  ;;  %1182 = vmatprep.mubr.bf16.mxu1 %v775_v31  ;;  %v771_v40 = vmax.f32 %v753_v34, 0.0 }
 0x295   : > { %v755_v37 = vpop.f32.mrf.mxu0  ;;  %1183 = vmatmul.mubr.bf16.vlgmr.msra.gmra.mxu1 %v776_v32 }
 0x296   : > { %v756_v38 = vadd.f32 %v1040_v18, %v755_v37  ;;  %v774_v39 = vmax.f32 %v764_v35, 0.0 }
 0x298   : > { %v772_v41 = vmax.f32 %v756_v38, 0.0  ;;  %v778_v44 = vpack.c.bf16 %v774_v39, %v773_v42 }
 0x29a   : > { %v777_v43 = vpack.c.bf16 %v772_v41, %v771_v40 }
 0x29c   : > { %1186 = vmatprep.mubr.bf16.mxu1 %v777_v43 }
 0x29d   : > { %1187 = vmatmul.mubr.bf16.gmra.mxu1 %v778_v44 }
 0x355   : > { %v1184_v46 = vpop.f32.mrf.mxu1 }
 0x356   : > { %v893_v47 = vadd.f32 %v1184_v46, %v1049_v45 }
 0x357   : > { %v884_v48 = vpop.f32.mrf.mxu1 }
 0x358   : > { %917 = vst [vmem:[%s341_s17 + $0x10] sm:$0xff] %v893_v47  ;;  %v885_v49 = vadd.f32 %v1049_v45, %v884_v48 }
 0x359   : > { %v1185_v50 = vpop.f32.mrf.mxu1 }
 0x35a   : > { %915 = vst [vmem:[%s341_s17] sm:$0xff] %v885_v49  ;;  %v896_v51 = vadd.f32 %v1185_v50, %v1049_v45 }
 0x35b   : > { %v887_v52 = vpop.f32.mrf.mxu1 }
 0x35c   : > { %918 = vst [vmem:[%s341_s17 + $0x18] sm:$0xff] %v896_v51  ;;  %v888_v53 = vadd.f32 %v1049_v45, %v887_v52 }
 0x35d   : > { %v1188_v54 = vpop.f32.mrf.mxu1 }
 0x35e   : > { %916 = vst [vmem:[%s341_s17 + $0x8] sm:$0xff] %v888_v53  ;;  %v909_v55 = vadd.f32 %v1188_v54, %v1049_v45 }
 0x35f   : > { %v900_v56 = vpop.f32.mrf.mxu1 }
 0x360   : > { %921 = vst [vmem:[%s341_s17 + $0x30] sm:$0xff] %v909_v55  ;;  %v901_v57 = vadd.f32 %v1049_v45, %v900_v56 }
 0x361   : > { %v1189_v58 = vpop.f32.mrf.mxu1 }
 0x362   : > { %919 = vst [vmem:[%s341_s17 + $0x20] sm:$0xff] %v901_v57  ;;  %v912_v59 = vadd.f32 %v1189_v58, %v1049_v45 }
 0x363   : > { %v903_v60 = vpop.f32.mrf.mxu1 }
 0x364   : > { %922 = vst [vmem:[%s341_s17 + $0x38] sm:$0xff] %v912_v59  ;;  %v904_v61 = vadd.f32 %v1049_v45, %v903_v60 }
 0x366   : > { %920 = vst [vmem:[%s341_s17 + $0x28] sm:$0xff] %v904_v61 }
 0x367   : > { %1313 = shalt.err (!%p1310_p0)
}
 0x368   : > { %s1314_s28 = scalar_lea.hbm %s1571_s26, 1024  ;;  %s1318_s23 = scalar_lea.hbm %s1624_s9, 4096 }
 0x369   : > { %p1315_p1 = scmp.ne.s32.totalorder %s1571_s26, %s1314_s28  ;;  %p1319_p4 = scmp.lt.s32.totalorder %s1571_s26, %s1624_s9 }
 0x36a   : > { %p1320_p7 = scmp.lt.s32.totalorder %s1318_s23, %s1314_s28 }
 0x36b   : > { %p1316_p2 = pnand %p1315_p1, %p1460_p5 }
 0x36c   : > { %p1321_p8 = por %p1320_p7, %p1319_p4 }
 0x36d   : > { %p1317_p3 = pneg %p1316_p2 }
 0x36f   : > { %p1322_p6 = pnand %p1321_p8, %p1317_p3 }
 0x371   : > { %1325 = shalt.err (!%p1322_p6)
}
 0x372   : > { %s1370_s13 = smov 128   ;;  %s1371_s27 = smov 8  }
 0x373   : > { %1194 = dma.vmem_to_hbm [thread:$0]  (%p1460_p5), %s1566_s24, 1024, %s1571_s26, %s1575_s22, %s1370_s13, %s1370_s13, %s1371_s27  }
 0x374 PF: > { %p1206_p9 = scmp.ge.s32.totalorder %s1364_s12, 2  ;;  %s952_s29 = sand.u32 1, %s1352_s30  }
 0x375   : > { %p1628_p10 = scmp.ne.s32.totalorder %s1626_s20, 0  ;;  %s953_s14 = scalar_lea.sflag [#allocation4], %s952_s29 }
 0x377   : > { %p1201_p11 = pnand %p1206_p9, %p1628_p10 }
 0x379   : > { %p1202_p12 = pneg %p1201_p11 }
 0x37b   : > { %1347 = dma.done.wait (%p1202_p12), %s953_s14, 1024  }
 0x37c   : > { %1349 = vsyncadd (%p1202_p12), %s953_s14, 4294966272  ;;  %p20_p13 = scmp.ge.s32.totalorder %s1447_s15, 6   ;;  %s1629_s30 = smov %s1356_s10 }
 0x37d   : > { %s1630_s10 = smov %s1360_s11  ;;  %s1631_s11 = smov %s1458_s18 }
 0x37e   : > { %s1632_s12 = smov %s1447_s15  ;;  %22 = sbr.rel (!%p20_p13) target bundleno = 4 (0x4), region = 96 }
 0x383   :  { %958 = vsyncpa [#allocation3], 1 }
 0x384   :  { %960 = vsyncpa [#allocation3 + $0x1], 1 }
 0x385   :  { %961 = vsyncpa [#allocation4], 1 }
 0x386   :  { %963 = vsyncpa [#allocation4 + $0x1], 1 }

// kernel: tpu_custom_call.1
= control target key start
LH: loop header
LB: loop body
LE: loop exit
PB: predicated region body
PF: predicated region fallthrough
CT: control target
= control target key end

     0   :  { %14 = vsyncpa [#allocation3], 0  ;;  %s1615_s0 = inlined_call_operand.vmem [shape: bf16[256,32], index: 0, kind: input, shape index: {}]   ;;  %s1616_s1 = inlined_call_operand.vmem [shape: bf16[32,128], index: 1, kind: input, shape index: {}]   ;;  %s1617_s2 = inlined_call_operand.vmem [shape: f32[1,128], index: 2, kind: input, shape index: {}]   ;;  %s1618_s3 = inlined_call_operand.vmem [shape: bf16[128,128], index: 3, kind: input, shape index: {}]   ;;  %s1619_s4 = inlined_call_operand.vmem [shape: f32[1,128], index: 4, kind: input, shape index: {}]   ;;  %s1620_s5 = inlined_call_operand.vmem [shape: bf16[128,128], index: 5, kind: input, shape index: {}]   ;;  %s1621_s6 = inlined_call_operand.vmem [shape: f32[1,128], index: 6, kind: input, shape index: {}]   ;;  %s1622_s7 = inlined_call_operand.hbm [shape: bf16[128,128], index: 7, kind: input, shape index: {}]   ;;  %s1623_s8 = inlined_call_operand.vmem [shape: f32[1,128], index: 8, kind: input, shape index: {}]   ;;  %s1624_s9 = inlined_call_operand.hbm [shape: f32[256,128], index: 9, kind: output, shape index: {}]  }
   0x1   :  { %15 = vsyncpa [#allocation4], 0 }
   0x2   :  { %17 = vsyncpa [#allocation4 + $0x1], 0  ;;  %s1422_s30 = smov 0   ;;  %s1424_s10 = smov 0  }
   0x3   :  { %s1426_s11 = smov 0   ;;  %s1428_s12 = smov 0  }
   0x4 LB: > { %s1443_s13 = sadd.s32 4294967295, %s1364_s12   ;;  %s1011_s14 = sadd.s32 4294967294, %s1364_s12   ;;  %s1364_s12 = sphi %s1428_s12, %s1632_s12   ;;  %s1360_s11 = sphi %s1426_s11, %s1631_s11   ;;  %s1356_s10 = sphi %s1424_s10, %s1630_s10   ;;  %s1352_s30 = sphi %s1422_s30, %s1629_s30  }
   0x5   : > { %s1447_s15 = sadd.s32 1, %s1364_s12   ;;  %s224_s16 = sadd.s32 1, %s1360_s11 }
   0x6   : > { %s221_s17 = ssub.s32 %s1364_s12, %s1447_s15  ;;  %p234_p0 = scmp.ne.s32.totalorder %s1360_s11, %s1356_s10 }
   0x7   : > { %p222_p1 = scmp.eq.s32.totalorder %s221_s17, 0  ;;  %p235_p2 = scmp.eq.s32.totalorder %s1443_s13, 3 }
   0x8   : > { %p240_p3 = scmp.ne.s32.totalorder %s1356_s10, %s1352_s30  ;;  %p241_p4 = scmp.eq.s32.totalorder %s1011_s14, 3 }
   0x9   : > { %s1458_s18 = scalar_select %p222_p1, %s1360_s11, %s224_s16  }
   0xa   : > { %p1460_p5 = por %p235_p2, %p234_p0  ;;  %p1464_p6 = por %p241_p4, %p240_p3 }
   0xb   : > { %p1012_p7 = scmp.ge.s32.totalorder %s1364_s12, 1  ;;  %p248_p8 = scmp.lt.s32.totalorder %s1364_s12, 5 }
   0xc   : > { %s1626_s20 = scalar_select %p1464_p6, 1, 0 }
   0xd   : > { %p1204_p9 = scmp.eq.s32.totalorder %s1443_s13, 0  ;;  %p1471_p10 = pnand %p1012_p7, %p248_p8 }
   0xe   : > { %s1366_s22 = smov [#allocation2]  }
   0xf   : > { %s278_s23 = sshll.u32 %s1366_s22, 4  ;;  %p1196_p11 = pneg %p1471_p10  ;;  %s279_s23 = int_to_ptr.vmem [resolvable:$true] %s278_s23 }
  0x10   : > { %s1285_s24 = scalar_lea.vmem %s279_s23, 1024  ;;  %p1293_p3 = scmp.lt.s32.totalorder %s279_s23, %s279_s23 }
  0x11   : > { %p1197_p12 = pnand %p1204_p9, %p1196_p11  ;;  %p1286_p0 = scmp.ne.s32.totalorder %s279_s23, %s1285_s24 }
  0x12   : > { %p1294_p4 = scmp.lt.s32.totalorder %s1285_s24, %s1285_s24 }
  0x13   : > { %p1276_p13 = pneg %p1197_p12 }
  0x14   : > { %p1295_p6 = por %p1294_p4, %p1293_p3 }
  0x15   : > { %p1288_p1 = pnand %p1286_p0, %p1276_p13 }
  0x17   : > { %p1289_p2 = pneg %p1288_p1 }
  0x19   : > { %p1296_p7 = pnand %p1295_p6, %p1289_p2 }
  0x1b   : > { %1299 = shalt.err (!%p1296_p7)
}
  0x1c   : > { %s1367_s25 = smov 64   ;;  %s1368_s26 = smov 4  }
  0x1d   : > { %1199 = dma.hbm_to_vmem [thread:$0]  (!%p1197_p12), %s1622_s7, 1024, %s279_s23, [#allocation3], %s1367_s25, %s1367_s25, %s1368_s26  }
  0x1e   : > { %306 = sbr.rel (%p1471_p10) target bundleno = 884 (0x374), region = 56 }
  0x23   : > { %1343 = dma.done.wait (%p1204_p9), [#allocation3], 1024  }
  0x24   : > { %1345 = vsyncadd (%p1204_p9), [#allocation3], 4294966272  ;;  %s1018_s29 = sshll.u32 %s1443_s13, 3  ;;  %v1244_v0 = vld [vmem:[%s1616_s1 + $0x8] sm:$0xff]   ;;  %v1245_v1 = vld [vmem:[%s1616_s1] sm:$0xff]   ;;  %vm401_vm0 = vcmask 261120  }
  0x25   : > { %p343_p8 = scmp.lt.s32.totalorder %s1018_s29, 31  ;;  %1106 = vmatprep.subr.bf16.mxu0 %v1244_v0  ;;  %v1250_v5 = vld [vmem:[%s1618_s3 + $0x38] sm:$0xff]   ;;  %v1251_v6 = vld [vmem:[%s1618_s3 + $0x30] sm:$0xff]   ;;  %v1252_v7 = vld [vmem:[%s1618_s3 + $0x28] sm:$0xff]   ;;  %s339_s28 = sand.u32 1, %s1356_s10  }
  0x26   : > { %1107 = vmatpush3.bf16.msra.mxu0 %v1244_v0  ;;  %1118 = vmatprep.subr.bf16.mxu1 %v1250_v5  ;;  %v1253_v9 = vld [vmem:[%s1618_s3 + $0x20] sm:$0xff]   ;;  %v1254_v10 = vld [vmem:[%s1618_s3 + $0x18] sm:$0xff]   ;;  %v1255_v11 = vld [vmem:[%s1618_s3 + $0x10] sm:$0xff]   ;;  %s1063_s23 = sshll.u32 %s1443_s13, 10  ;;  %s1369_s27 = smov [#allocation5]  }
  0x27   : > { %s1634_s29 = smov (!%p343_p8, %s1018_s29), 31  ;;  %1108 = vmatprep.subr.bf16.mxu0 %v1245_v1  ;;  %1119 = vmatpush3.bf16.msra.mxu1 %v1250_v5  ;;  %v1256_v12 = vld [vmem:[%s1618_s3 + $0x8] sm:$0xff]   ;;  %v1257_v13 = vld [vmem:[%s1618_s3] sm:$0xff]   ;;  %v1258_v14 = vld [vmem:[%s1620_s5 + $0x38] sm:$0xff]   ;;  %s1571_s26 = scalar_lea.hbm %s1624_s9, %s1063_s23 }
  0x28   : > { %s1019_s14 = sshll.u32 %s1634_s29, 2  ;;  %1120 = vmatprep.subr.bf16.mxu1 %v1251_v6  ;;  %v1259_v15 = vld [vmem:[%s1620_s5 + $0x30] sm:$0xff]   ;;  %v1260_v16 = vld [vmem:[%s1620_s5 + $0x28] sm:$0xff]   ;;  %v1261_v17 = vld [vmem:[%s1620_s5 + $0x20] sm:$0xff]   ;;  %s1017_s29 = sshll.u32 %s339_s28, 6 }
  0x29   : > { %s346_s22 = scalar_lea.vmem %s1615_s0, %s1019_s14  ;;  %v1262_v18 = vld [vmem:[%s1620_s5 + $0x18] sm:$0xff]   ;;  %v1020_v21 = vld [vmem:[%s1617_s2] ss:$0 sm:$0xff]  ;;  %v1263_v48 = vld [vmem:[%s1620_s5 + $0x10] sm:$0xff]   ;;  %s341_s17 = scalar_lea.vmem [#allocation5], %s1017_s29 }
  0x2a   : > { %v1246_v2 = vld [vmem:[%s346_s22] sm:$0xff]   ;;  %v1247_v3 = vld [vmem:[%s346_s22 + $0x8] sm:$0xff]   ;;  %v1248_v4 = vld [vmem:[%s346_s22 + $0x10] sm:$0xff]   ;;  %1109 = vmatpush3.bf16.msra.mxu0 %v1245_v1  ;;  %s937_s24 = sshll.u32 %s341_s17, 4  ;;  %s1304_s29 = sshll.u32 %s1369_s27, 4  ;;  %s1566_s24 = int_to_ptr.vmem [resolvable:$true] %s937_s24  ;;  %s1305_s29 = int_to_ptr.vmem [resolvable:$false] %s1304_s29 }
  0x2b   : > { %1110 = vmatprep.mubr.msk.bf16.mxu0 %vm401_vm0, %v1246_v2  ;;  %v1249_v8 = vld [vmem:[%s346_s22 + $0x18] sm:$0xff]   ;;  %1121 = vmatpush3.bf16.msra.mxu1 %v1251_v6  ;;  %v1264_v49 = vld [vmem:[%s1620_s5 + $0x8] sm:$0xff]   ;;  %v1265_v50 = vld [vmem:[%s1620_s5] sm:$0xff]   ;;  %s1575_s22 = scalar_lea.sflag [#allocation4], %s339_s28  ;;  %s1300_s13 = scalar_lea.vmem %s1566_s24, 1024 }
  0x2c   : > { %1122 = vmatprep.subr.bf16.mxu1 %v1252_v7  ;;  %1142 = vmatprep.subr.bf16.mxu0 %v1258_v14  ;;  %v1266_v51 = vld [vmem:[#allocation2 + $0x38] sm:$0xff]   ;;  %v1267_v52 = vld [vmem:[#allocation2 + $0x30] sm:$0xff]   ;;  %v1268_v53 = vld [vmem:[#allocation2 + $0x28] sm:$0xff]   ;;  %p1301_p6 = scmp.ne.s32.totalorder %s1566_s24, %s1300_s13  ;;  %s1306_s14 = scalar_lea.vmem %s1305_s29, 2048 }
  0x2d   : > { %1111 = vmatmul.mubr.msk.bf16.vlgmr.msra.gmra.mxu0 %vm401_vm0, %v1247_v3  ;;  %v1269_v54 = vld [vmem:[#allocation2 + $0x20] sm:$0xff]   ;;  %v1270_v55 = vld [vmem:[#allocation2 + $0x18] sm:$0xff]   ;;  %p1307_p11 = scmp.lt.s32.totalorder %s1566_s24, %s1305_s29  ;;  %p1308_p12 = scmp.lt.s32.totalorder %s1306_s14, %s1300_s13 }
  0x2e   : > { %1114 = vmatprep.mubr.msk.bf16.mxu0 %vm401_vm0, %v1248_v4  ;;  %1143 = vmatpush3.bf16.msra.mxu0 %v1258_v14  ;;  %v1031_v59 = vld [vmem:[%s1619_s4] ss:$0 sm:$0xff]  ;;  %v1272_v14 = vld [vmem:[#allocation2 + $0x8] sm:$0xff]   ;;  %p1302_p9 = pnand %p1301_p6, %p1460_p5 }
  0x2f   : > { %1123 = vmatpush3.bf16.msra.mxu1 %v1252_v7  ;;  %1144 = vmatprep.subr.bf16.mxu0 %v1259_v15  ;;  %p1309_p13 = por %p1308_p12, %p1307_p11 }
  0x30   : > { %1124 = vmatprep.subr.bf16.mxu1 %v1253_v9  ;;  %p1303_p10 = pneg %p1302_p9 }
  0x32   : > { %1145 = vmatpush3.bf16.msra.mxu0 %v1259_v15  ;;  %v1273_v15 = vld [vmem:[#allocation2] sm:$0xff]   ;;  %p1310_p0 = pnand %p1309_p13, %p1303_p10 }
  0x33   : > { %1125 = vmatpush3.bf16.msra.mxu1 %v1253_v9  ;;  %1146 = vmatprep.subr.bf16.mxu0 %v1260_v16 }
  0x34   : > { %1126 = vmatprep.subr.bf16.mxu1 %v1254_v10 }
  0x35   : > { %1115 = vmatmul.mubr.msk.bf16.gmra.mxu0 %vm401_vm0, %v1249_v8 }
  0x36   : > { %1147 = vmatpush3.bf16.msra.mxu0 %v1260_v16 }
  0x37   : > { %1127 = vmatpush3.bf16.msra.mxu1 %v1254_v10  ;;  %1148 = vmatprep.subr.bf16.mxu0 %v1261_v17 }
  0x38   : > { %1128 = vmatprep.subr.bf16.mxu1 %v1255_v11 }
  0x3a   : > { %1149 = vmatpush3.bf16.msra.mxu0 %v1261_v17 }
  0x3b   : > { %1129 = vmatpush3.bf16.msra.mxu1 %v1255_v11  ;;  %1150 = vmatprep.subr.bf16.mxu0 %v1262_v18 }
  0x3c   : > { %1130 = vmatprep.subr.bf16.mxu1 %v1256_v12 }
  0x3e   : > { %1151 = vmatpush3.bf16.msra.mxu0 %v1262_v18  ;;  %v1040_v18 = vld [vmem:[%s1621_s6] ss:$0 sm:$0xff] }
  0x3f   : > { %1131 = vmatpush3.bf16.msra.mxu1 %v1256_v12  ;;  %1152 = vmatprep.subr.bf16.mxu0 %v1263_v48 }
  0x40   : > { %1132 = vmatprep.subr.bf16.mxu1 %v1257_v13 }
  0x42   : > { %1153 = vmatpush3.bf16.msra.mxu0 %v1263_v48 }
  0x43   : > { %1133 = vmatpush3.bf16.msra.mxu1 %v1257_v13  ;;  %1154 = vmatprep.subr.bf16.mxu0 %v1264_v49  ;;  %v1271_v13 = vld [vmem:[#allocation2 + $0x10] sm:$0xff]  }
  0x44   : > { %1166 = vmatprep.subr.bf16.mxu1 %v1266_v51 }
  0x46   : > { %1155 = vmatpush3.bf16.msra.mxu0 %v1264_v49 }
  0x47   : > { %1156 = vmatprep.subr.bf16.mxu0 %v1265_v50 }
  0x4a   : > { %1157 = vmatpush3.bf16.msra.mxu0 %v1265_v50 }
  0xed   : > { %v1112_v19 = vpop.f32.mrf.mxu0 }
  0xee   : > { %v457_v25 = vadd.f32 %v1112_v19, %v1020_v21 }
  0xef   : > { %v448_v20 = vpop.f32.mrf.mxu0 }
  0xf0   : > { %v449_v23 = vadd.f32 %v1020_v21, %v448_v20  ;;  %v481_v32 = vmax.f32 %v457_v25, 0.0 }
  0xf1   : > { %v1113_v22 = vpop.f32.mrf.mxu0 }
  0xf2   : > { %v460_v24 = vadd.f32 %v1113_v22, %v1020_v21  ;;  %v479_v30 = vmax.f32 %v449_v23, 0.0 }
  0xf3   : > { %v451_v26 = vpop.f32.mrf.mxu0 }
  0xf4   : > { %v452_v27 = vadd.f32 %v1020_v21, %v451_v26  ;;  %v482_v28 = vmax.f32 %v460_v24, 0.0 }
  0xf5   : > { %v1116_v29 = vpop.f32.mrf.mxu0 }
  0xf6   : > { %v480_v31 = vmax.f32 %v452_v27, 0.0  ;;  %v488_v35 = vpack.c.bf16 %v482_v28, %v481_v32  ;;  %v473_v39 = vadd.f32 %v1116_v29, %v1020_v21 }
  0xf7   : > { %v464_v33 = vpop.f32.mrf.mxu0 }
  0xf8   : > { %v487_v34 = vpack.c.bf16 %v480_v31, %v479_v30  ;;  %v465_v37 = vadd.f32 %v1020_v21, %v464_v33  ;;  %v485_v45 = vmax.f32 %v473_v39, 0.0 }
  0xf9   : > { %v1117_v36 = vpop.f32.mrf.mxu0 }
  0xfa   : > { %v476_v38 = vadd.f32 %v1117_v36, %v1020_v21  ;;  %1134 = vmatprep.mubr.bf16.mxu1 %v487_v34  ;;  %v483_v43 = vmax.f32 %v465_v37, 0.0 }
  0xfb   : > { %v467_v40 = vpop.f32.mrf.mxu0  ;;  %1135 = vmatmul.mubr.bf16.vlgmr.msra.gmra.mxu1 %v488_v35 }
  0xfc   : > { %v468_v41 = vadd.f32 %v1020_v21, %v467_v40  ;;  %v486_v42 = vmax.f32 %v476_v38, 0.0  ;;  %1167 = vmatpush3.bf16.msra.mxu1 %v1266_v51 }
  0xfd   : > { %1168 = vmatprep.subr.bf16.mxu1 %v1267_v52 }
  0xfe   : > { %v484_v44 = vmax.f32 %v468_v41, 0.0  ;;  %v490_v47 = vpack.c.bf16 %v486_v42, %v485_v45  ;;  %v1049_v45 = vld [vmem:[%s1623_s8] ss:$0 sm:$0xff] }
 0x100   : > { %v489_v46 = vpack.c.bf16 %v484_v44, %v483_v43  ;;  %1169 = vmatpush3.bf16.msra.mxu1 %v1267_v52 }
 0x101   : > { %1170 = vmatprep.subr.bf16.mxu1 %v1268_v53 }
 0x102   : > { %1138 = vmatprep.mubr.bf16.mxu1 %v489_v46 }
 0x103   : > { %1139 = vmatmul.mubr.bf16.gmra.mxu1 %v490_v47 }
 0x104   : > { %1171 = vmatpush3.bf16.msra.mxu1 %v1268_v53 }
 0x105   : > { %1172 = vmatprep.subr.bf16.mxu1 %v1269_v54 }
 0x108   : > { %1173 = vmatpush3.bf16.msra.mxu1 %v1269_v54 }
 0x109   : > { %1174 = vmatprep.subr.bf16.mxu1 %v1270_v55 }
 0x10c   : > { %1175 = vmatpush3.bf16.msra.mxu1 %v1270_v55 }
 0x10d   : > { %1176 = vmatprep.subr.bf16.mxu1 %v1271_v13 }
 0x110   : > { %1177 = vmatpush3.bf16.msra.mxu1 %v1271_v13 }
 0x111   : > { %1178 = vmatprep.subr.bf16.mxu1 %v1272_v14 }
 0x114   : > { %1179 = vmatpush3.bf16.msra.mxu1 %v1272_v14 }
 0x115   : > { %1180 = vmatprep.subr.bf16.mxu1 %v1273_v15 }
 0x118   : > { %1181 = vmatpush3.bf16.msra.mxu1 %v1273_v15 }
 0x1bb   : > { %v1136_v56 = vpop.f32.mrf.mxu1 }
 0x1bc   : > { %v605_v0 = vadd.f32 %v1136_v56, %v1031_v59 }
 0x1bd   : > { %v596_v57 = vpop.f32.mrf.mxu1 }
 0x1be   : > { %v597_v62 = vadd.f32 %v1031_v59, %v596_v57 }
 0x1bf   : > { %v1137_v58 = vpop.f32.mrf.mxu1 }
 0x1c0   : > { %v608_v60 = vadd.f32 %v1137_v58, %v1031_v59 }
 0x1c1   : > { %v599_v61 = vpop.f32.mrf.mxu1 }
 0x1c2   : > { %v600_v63 = vadd.f32 %v1031_v59, %v599_v61  ;;  %v628_v3 = vpack.c.bf16 %v608_v60, %v605_v0 }
 0x1c3   : > { %v1140_v1 = vpop.f32.mrf.mxu1 }
 0x1c4   : > { %v627_v2 = vpack.c.bf16 %v600_v63, %v597_v62  ;;  %v621_v10 = vadd.f32 %v1140_v1, %v1031_v59 }
 0x1c5   : > { %v612_v4 = vpop.f32.mrf.mxu1 }
 0x1c6   : > { %1158 = vmatprep.mubr.bf16.mxu0 %v627_v2  ;;  %v613_v8 = vadd.f32 %v1031_v59, %v612_v4 }
 0x1c7   : > { %v1141_v5 = vpop.f32.mrf.mxu1  ;;  %1159 = vmatmul.mubr.bf16.vlgmr.msra.gmra.mxu0 %v628_v3 }
 0x1c8   : > { %v624_v6 = vadd.f32 %v1141_v5, %v1031_v59 }
 0x1c9   : > { %v615_v7 = vpop.f32.mrf.mxu1 }
 0x1ca   : > { %v616_v9 = vadd.f32 %v1031_v59, %v615_v7  ;;  %v630_v12 = vpack.c.bf16 %v624_v6, %v621_v10 }
 0x1cc   : > { %v629_v11 = vpack.c.bf16 %v616_v9, %v613_v8 }
 0x1ce   : > { %1162 = vmatprep.mubr.bf16.mxu0 %v629_v11 }
 0x1cf   : > { %1163 = vmatmul.mubr.bf16.gmra.mxu0 %v630_v12 }
 0x287   : > { %v1160_v16 = vpop.f32.mrf.mxu0 }
 0x288   : > { %v745_v22 = vadd.f32 %v1160_v16, %v1040_v18 }
 0x289   : > { %v736_v17 = vpop.f32.mrf.mxu0 }
 0x28a   : > { %v737_v20 = vadd.f32 %v1040_v18, %v736_v17  ;;  %v769_v29 = vmax.f32 %v745_v22, 0.0 }
 0x28b   : > { %v1161_v19 = vpop.f32.mrf.mxu0 }
 0x28c   : > { %v748_v21 = vadd.f32 %v1161_v19, %v1040_v18  ;;  %v767_v27 = vmax.f32 %v737_v20, 0.0 }
 0x28d   : > { %v739_v23 = vpop.f32.mrf.mxu0 }
 0x28e   : > { %v740_v24 = vadd.f32 %v1040_v18, %v739_v23  ;;  %v770_v25 = vmax.f32 %v748_v21, 0.0 }
 0x28f   : > { %v1164_v26 = vpop.f32.mrf.mxu0 }
 0x290   : > { %v768_v28 = vmax.f32 %v740_v24, 0.0  ;;  %v776_v32 = vpack.c.bf16 %v770_v25, %v769_v29  ;;  %v761_v36 = vadd.f32 %v1164_v26, %v1040_v18 }
 0x291   : > { %v752_v30 = vpop.f32.mrf.mxu0 }
 0x292   : > { %v775_v31 = vpack.c.bf16 %v768_v28, %v767_v27  ;;  %v753_v34 = vadd.f32 %v1040_v18, %v752_v30  ;;  %v773_v42 = vmax.f32 %v761_v36, 0.0 }
 0x293   : > { %v1165_v33 = vpop.f32.mrf.mxu0 }
 0x294   : > { %v764_v35 = vadd.f32 %v1165_v33, %v1040_v18  ;;  %1182 = vmatprep.mubr.bf16.mxu1 %v775_v31  ;;  %v771_v40 = vmax.f32 %v753_v34, 0.0 }
 0x295   : > { %v755_v37 = vpop.f32.mrf.mxu0  ;;  %1183 = vmatmul.mubr.bf16.vlgmr.msra.gmra.mxu1 %v776_v32 }
 0x296   : > { %v756_v38 = vadd.f32 %v1040_v18, %v755_v37  ;;  %v774_v39 = vmax.f32 %v764_v35, 0.0 }
 0x298   : > { %v772_v41 = vmax.f32 %v756_v38, 0.0  ;;  %v778_v44 = vpack.c.bf16 %v774_v39, %v773_v42 }
 0x29a   : > { %v777_v43 = vpack.c.bf16 %v772_v41, %v771_v40 }
 0x29c   : > { %1186 = vmatprep.mubr.bf16.mxu1 %v777_v43 }
 0x29d   : > { %1187 = vmatmul.mubr.bf16.gmra.mxu1 %v778_v44 }
 0x355   : > { %v1184_v46 = vpop.f32.mrf.mxu1 }
 0x356   : > { %v893_v47 = vadd.f32 %v1184_v46, %v1049_v45 }
 0x357   : > { %v884_v48 = vpop.f32.mrf.mxu1 }
 0x358   : > { %917 = vst [vmem:[%s341_s17 + $0x10] sm:$0xff] %v893_v47  ;;  %v885_v49 = vadd.f32 %v1049_v45, %v884_v48 }
 0x359   : > { %v1185_v50 = vpop.f32.mrf.mxu1 }
 0x35a   : > { %915 = vst [vmem:[%s341_s17] sm:$0xff] %v885_v49  ;;  %v896_v51 = vadd.f32 %v1185_v50, %v1049_v45 }
 0x35b   : > { %v887_v52 = vpop.f32.mrf.mxu1 }
 0x35c   : > { %918 = vst [vmem:[%s341_s17 + $0x18] sm:$0xff] %v896_v51  ;;  %v888_v53 = vadd.f32 %v1049_v45, %v887_v52 }
 0x35d   : > { %v1188_v54 = vpop.f32.mrf.mxu1 }
 0x35e   : > { %916 = vst [vmem:[%s341_s17 + $0x8] sm:$0xff] %v888_v53  ;;  %v909_v55 = vadd.f32 %v1188_v54, %v1049_v45 }
 0x35f   : > { %v900_v56 = vpop.f32.mrf.mxu1 }
 0x360   : > { %921 = vst [vmem:[%s341_s17 + $0x30] sm:$0xff] %v909_v55  ;;  %v901_v57 = vadd.f32 %v1049_v45, %v900_v56 }
 0x361   : > { %v1189_v58 = vpop.f32.mrf.mxu1 }
 0x362   : > { %919 = vst [vmem:[%s341_s17 + $0x20] sm:$0xff] %v901_v57  ;;  %v912_v59 = vadd.f32 %v1189_v58, %v1049_v45 }
 0x363   : > { %v903_v60 = vpop.f32.mrf.mxu1 }
 0x364   : > { %922 = vst [vmem:[%s341_s17 + $0x38] sm:$0xff] %v912_v59  ;;  %v904_v61 = vadd.f32 %v1049_v45, %v903_v60 }
 0x366   : > { %920 = vst [vmem:[%s341_s17 + $0x28] sm:$0xff] %v904_v61 }
 0x367   : > { %1313 = shalt.err (!%p1310_p0)
}
 0x368   : > { %s1314_s28 = scalar_lea.hbm %s1571_s26, 1024  ;;  %s1318_s23 = scalar_lea.hbm %s1624_s9, 4096 }
 0x369   : > { %p1315_p1 = scmp.ne.s32.totalorder %s1571_s26, %s1314_s28  ;;  %p1319_p4 = scmp.lt.s32.totalorder %s1571_s26, %s1624_s9 }
 0x36a   : > { %p1320_p7 = scmp.lt.s32.totalorder %s1318_s23, %s1314_s28 }
 0x36b   : > { %p1316_p2 = pnand %p1315_p1, %p1460_p5 }
 0x36c   : > { %p1321_p8 = por %p1320_p7, %p1319_p4 }
 0x36d   : > { %p1317_p3 = pneg %p1316_p2 }
 0x36f   : > { %p1322_p6 = pnand %p1321_p8, %p1317_p3 }
 0x371   : > { %1325 = shalt.err (!%p1322_p6)
}
 0x372   : > { %s1370_s13 = smov 128   ;;  %s1371_s27 = smov 8  }
 0x373   : > { %1194 = dma.vmem_to_hbm [thread:$0]  (%p1460_p5), %s1566_s24, 1024, %s1571_s26, %s1575_s22, %s1370_s13, %s1370_s13, %s1371_s27  }
 0x374 PF: > { %p1206_p9 = scmp.ge.s32.totalorder %s1364_s12, 2  ;;  %s952_s29 = sand.u32 1, %s1352_s30  }
 0x375   : > { %p1628_p10 = scmp.ne.s32.totalorder %s1626_s20, 0  ;;  %s953_s14 = scalar_lea.sflag [#allocation4], %s952_s29 }
 0x377   : > { %p1201_p11 = pnand %p1206_p9, %p1628_p10 }
 0x379   : > { %p1202_p12 = pneg %p1201_p11 }
 0x37b   : > { %1347 = dma.done.wait (%p1202_p12), %s953_s14, 1024  }
 0x37c   : > { %1349 = vsyncadd (%p1202_p12), %s953_s14, 4294966272  ;;  %p20_p13 = scmp.ge.s32.totalorder %s1447_s15, 6   ;;  %s1629_s30 = smov %s1356_s10 }
 0x37d   : > { %s1630_s10 = smov %s1360_s11  ;;  %s1631_s11 = smov %s1458_s18 }
 0x37e   : > { %s1632_s12 = smov %s1447_s15  ;;  %22 = sbr.rel (!%p20_p13) target bundleno = 4 (0x4), region = 96 }
 0x383   :  { %958 = vsyncpa [#allocation3], 1 }
 0x384   :  { %960 = vsyncpa [#allocation3 + $0x1], 1 }
 0x385   :  { %961 = vsyncpa [#allocation4], 1 }
 0x386   :  { %963 = vsyncpa [#allocation4 + $0x1], 1 }

</bundles_post_ra>
